<compile_context>
chip_gen: v7x
topology: tpu7x:2x2x1
jax: 0.10.0
libtpu: 0.0.40
codegen_flags: <defaults>
</compile_context>

<pallas_src>
import functools

import numpy as np

import jax
import jax.numpy as jnp
from jax.experimental import pallas as pl
from jax.experimental.pallas import tpu as pltpu

# ----------------------------- model sizes ---------------------------------
M = 2            # batch (number of examples)
N_COLORS = 3     # colors per context
P_COLOR = 16     # color feature dim
K_SEQ = 8        # padded caption length
VOCAB = 32       # vocabulary size
EMBED = 32       # token embedding dim
HIDDEN = 32      # hidden dim (== EMBED so color rep adds to token embeddings)
SLAB_LANES = 128 # lane width of the packed operand slab and the kernel outputs


def _round8(r):
    return (r + 7) // 8 * 8


def _vmem_spec():
    return pl.BlockSpec(memory_space=pltpu.MemorySpace.VMEM)


def _b16(x):
    return x.astype(jnp.bfloat16)


# --------------------- packed single-DMA operand slab -----------------------
def _make_layout(m, n, p, k, vocab, e, h):
    """Row layout of the single (rows, 128) f32 operand slab (data + weights +
    hoisted constants).  Every block starts on an 8-row boundary so static
    in-kernel views never straddle (8,128) tiles."""
    entries = [
        # per-call data
        ("colors",       (m * n, p)),          # color_seqs flattened to 2-D
        ("onehot_words", (m * k, vocab)),      # wrapper-built token one-hot
        # parameters
        ("embedding",    (vocab, e)),
        ("w_color",      (p, 2 * h)),          # [w_color_enc | w_color_lst]
        ("biases",       (3, max(h, vocab))),  # rows: b_color_enc, b_out, b_cap
        ("w_out",        (h, vocab)),
        ("w_cap",        (e, h)),
        # hoisted constants (numpy-built, folded at trace time)
        ("iota_v",       (m * k, vocab)),      # vocab lane iota (argmax / one-hot)
        ("rep_bcast",    (m * k, m * n)),      # context mean + per-token broadcast
        ("cap_pool",     (m, m * k)),          # strip START/STOP + caption mean
        ("sel_mn_m",     (m * n, m)),          # broadcast caption rep to color rows
        ("blockdiag",    (m, m * n)),          # gather per-example color rows
        ("scatter_n",    (m * n, SLAB_LANES)), # scores -> lane-dense (m, 128) slab
        ("pad_vocab",    (vocab, SLAB_LANES)), # logits -> lane-dense (m*k, 128) slab
    ]
    layout, row = {}, 0
    for name, (r, c) in entries:
        layout[name] = (row, r, c)
        row += _round8(r)
    return layout, row


def _make_constants(m, n, p, k, vocab, e, h):
    """Kernel constants hoisted out of the kernel body (perf review: no
    runtime broadcasted_iota / compare / mask building inside the kernel)."""
    iota_v = np.broadcast_to(np.arange(vocab, dtype=np.float32),
                             (m * k, vocab)).copy()
    rep_bcast = np.zeros((m * k, m * n), np.float32)
    cap_pool = np.zeros((m, m * k), np.float32)
    sel_mn_m = np.zeros((m * n, m), np.float32)
    blockdiag = np.zeros((m, m * n), np.float32)
    for i in range(m):
        # mean over the n context colors, broadcast to each of the k token rows
        rep_bcast[i * k:(i + 1) * k, i * n:(i + 1) * n] = 1.0 / n
        # output_captions[:, 1:-1]: every greedy caption is padded to k tokens,
        # so positions 1 .. k-2 are kept and mean-pooled with weight 1/(k-2).
        cap_pool[i, i * k + 1:i * k + (k - 1)] = 1.0 / (k - 2)
        sel_mn_m[i * n:(i + 1) * n, i] = 1.0
        blockdiag[i, i * n:(i + 1) * n] = 1.0
    scatter_n = np.zeros((m * n, SLAB_LANES), np.float32)
    scatter_n[np.arange(m * n), np.arange(m * n) % n] = 1.0
    pad_vocab = np.eye(vocab, SLAB_LANES, dtype=np.float32)
    return dict(iota_v=iota_v, rep_bcast=rep_bcast, cap_pool=cap_pool,
                sel_mn_m=sel_mn_m, blockdiag=blockdiag, scatter_n=scatter_n,
                pad_vocab=pad_vocab)


def _pack_slab(layout, arrays):
    blocks = []
    for name, (_, r, c) in layout.items():
        a = jnp.asarray(arrays[name], dtype=jnp.float32)
        blocks.append(jnp.pad(a, ((0, _round8(r) - r), (0, SLAB_LANES - c))))
    return jnp.concatenate(blocks, axis=0)


def _read(slab_ref, layout, name):
    r0, r, c = layout[name]
    return slab_ref[pl.ds(r0, r), pl.ds(0, c)]


# ------------------------- shared speaker body ------------------------------
def _speaker_from_slab(slab_ref, layout):
    """Teacher-forced vocab logits; everything 2-D / lane-dense, bf16 MXU
    operands with f32 accumulation."""
    f32 = jnp.float32
    rd = functools.partial(_read, slab_ref, layout)
    h = layout["w_cap"][2]
    vocab = layout["w_out"][2]

    onehot_w = _b16(rd("onehot_words"))           # (m*k, v)
    emb_b = _b16(rd("embedding"))                 # (v, e)
    colors = _b16(rd("colors"))                   # (m*n, p)
    w_color = _b16(rd("w_color"))                 # (p, 2h)
    rep_bcast = _b16(rd("rep_bcast"))             # (m*k, m*n)
    w_out = _b16(rd("w_out"))                     # (h, v)
    biases = rd("biases")                         # (3, max(h, v)) f32
    b_color = biases[0:1, 0:h]
    b_out = biases[1:2, 0:vocab]

    # Token embedding lookup as a one-hot matmul (exact in bf16).
    embedded = jnp.dot(onehot_w, emb_b, preferred_element_type=f32)      # (m*k, e)
    # Fused color projections: speaker-encoder half | listener half.
    color_all = jnp.dot(colors, w_color, preferred_element_type=f32)     # (m*n, 2h)
    color_enc = _b16(color_all[:, 0:h])
    color_proj = color_all[:, h:2 * h]                                   # f32, listener half
    # mean-over-context + broadcast-to-token-rows folded into one constant matmul
    rep_mk = jnp.dot(rep_bcast, color_enc, preferred_element_type=f32) + b_color
    hidden = jnp.tanh(embedded + rep_mk)          # (m*k, h); requires e == h
    logits = jnp.dot(_b16(hidden), w_out, preferred_element_type=f32) + b_out
    return logits, color_proj, emb_b


# -------------------- fused training kernel (speaker + listener) ------------
def _fused_train_kernel(layout, slab_ref, scores_ref):
    f32 = jnp.float32
    rd = functools.partial(_read, slab_ref, layout)
    h = layout["w_cap"][2]
    vocab = layout["w_out"][2]

    # ---- speaker: teacher-forced vocab logits (kept in VMEM only) ----
    logits, color_proj, emb_b = _speaker_from_slab(slab_ref, layout)

    iota_v = rd("iota_v")                         # (m*k, v) f32
    cap_pool = _b16(rd("cap_pool"))               # (m, m*k)
    w_cap = _b16(rd("w_cap"))                     # (e, h)
    sel_mn_m = _b16(rd("sel_mn_m"))               # (m*n, m)
    blockdiag = rd("blockdiag")                   # (m, m*n) f32
    scatter_n = rd("scatter_n")                   # (m*n, 128) f32
    b_cap = rd("biases")[2:3, 0:h]                # (1, h) f32

    # Greedy caption = first-max argmax over the vocab lanes, done 2-D.  Fill
    # value vocab-1 keeps the token id in range for degenerate (all-NaN) rows.
    # TODO(synk): replace with jnp.argmax once argmax_p has a Mosaic lowering.
    mx = jnp.max(logits, axis=-1, keepdims=True)                         # (m*k, 1)
    caps = jnp.min(jnp.where(logits == mx, iota_v, float(vocab - 1)),
                   axis=-1, keepdims=True)                               # (m*k, 1)
    cap_onehot = _b16((caps == iota_v).astype(f32))                      # (m*k, v)

    # ---- listener: re-embed caption, pool (START/STOP stripped), score ----
    cap_emb = jnp.dot(cap_onehot, emb_b, preferred_element_type=f32)     # (m*k, e)
    cap_rep = jnp.dot(cap_pool, _b16(cap_emb),
                      preferred_element_type=f32)                        # (m, e)
    cap_hidden = jnp.tanh(jnp.dot(_b16(cap_rep), w_cap,
                                  preferred_element_type=f32) + b_cap)   # (m, h)

    # score[i, j] = <cap_hidden[i], color_proj[i*n+j]>, all 2-D:
    cap_h_rows = jnp.dot(sel_mn_m, _b16(cap_hidden),
                         preferred_element_type=f32)                     # (m*n, h)
    row_scores = jnp.sum(cap_h_rows * color_proj, axis=-1, keepdims=True)  # (m*n, 1)
    # Lane-dense writeback: place color j's score in lane j, gather the n rows
    # of each example with a constant matmul -> unmasked (m, 128) store.
    scores_ref[...] = jnp.dot(blockdiag, row_scores * scatter_n,
                              preferred_element_type=f32)


# -------------------------- eval (speaker-only) kernel ----------------------
def _speaker_eval_kernel(layout, slab_ref, logits_ref):
    f32 = jnp.float32
    logits, _, _ = _speaker_from_slab(slab_ref, layout)
    pad_vocab = _read(slab_ref, layout, "pad_vocab")                     # (v, 128)
    # Lane-dense 2-D writeback; the (m, k, v) -> (m, v, k) reshuffle happens in
    # the wrapper so no sublane-splitting reshape runs inside the kernel.
    logits_ref[...] = jnp.dot(logits, pad_vocab, preferred_element_type=f32)


# ------------------------------ wrappers ------------------------------------
def _cost_estimate(m, n, p, k, vocab, e, h, slab_bytes, out_bytes, training):
    mk, mn = m * k, m * n
    flops = 2 * (mk * vocab * e        # one-hot token embedding
                 + mn * p * 2 * h      # fused color projections
                 + mk * mn * h         # context mean + per-token broadcast
                 + mk * h * vocab)     # vocab projection
    trans = mk * h
    if training:
        flops += 2 * (mk * vocab * e   # caption re-embedding
                      + m * mk * e     # caption pooling
                      + m * e * h      # caption encoder
                      + mn * m * h     # caption rep broadcast
                      + m * mn * SLAB_LANES)  # score gather/scatter
        trans += m * h
    else:
        flops += 2 * mk * vocab * SLAB_LANES   # lane-dense logits pad
    return pl.CostEstimate(flops=flops, transcendentals=trans,
                           bytes_accessed=slab_bytes + out_bytes)


def init_params(key):
    ks = jax.random.split(key, 5)
    s = 0.02
    return {
        "embedding":   jax.random.normal(ks[0], (VOCAB, EMBED), jnp.float32) * s,
        "w_color_enc": jax.random.normal(ks[1], (P_COLOR, HIDDEN), jnp.float32) * s,
        "b_color_enc": jnp.zeros((1, HIDDEN), jnp.float32),
        "w_out":       jax.random.normal(ks[2], (HIDDEN, VOCAB), jnp.float32) * s,
        "b_out":       jnp.zeros((1, VOCAB), jnp.float32),
        "w_cap":       jax.random.normal(ks[3], (EMBED, HIDDEN), jnp.float32) * s,
        "b_cap":       jnp.zeros((1, HIDDEN), jnp.float32),
        "w_color_lst": jax.random.normal(ks[4], (P_COLOR, HIDDEN), jnp.float32) * s,
    }


@functools.partial(jax.jit, static_argnames=("training",))
def encoder_decoder_listener_forward(params, color_seqs, word_seqs, training=True):
    m, n, p = color_seqs.shape
    k = word_seqs.shape[1]
    vocab, e = params["embedding"].shape
    h = params["w_cap"].shape[1]

    layout, total_rows = _make_layout(m, n, p, k, vocab, e, h)
    slab_bytes = total_rows * SLAB_LANES * 4

    # Pack per-call data + params + hoisted constants into ONE lane-dense f32
    # slab -> a single operand DMA instead of ten tiny ones.
    bw = max(h, vocab)
    biases = jnp.zeros((3, bw), jnp.float32)
    biases = biases.at[0, :h].set(params["b_color_enc"].reshape(-1))
    biases = biases.at[1, :vocab].set(params["b_out"].reshape(-1))
    biases = biases.at[2, :h].set(params["b_cap"].reshape(-1))
    arrays = dict(
        colors=color_seqs.reshape(m * n, p),
        onehot_words=jax.nn.one_hot(word_seqs.reshape(m * k).astype(jnp.int32),
                                    vocab, dtype=jnp.float32),
        embedding=params["embedding"],
        w_color=jnp.concatenate([params["w_color_enc"], params["w_color_lst"]],
                                axis=1),
        biases=biases,
        w_out=params["w_out"],
        w_cap=params["w_cap"],
        **_make_constants(m, n, p, k, vocab, e, h),
    )
    slab = _pack_slab(layout, arrays)

    # NOTE: gridless single-block design is right at these toy sizes (the
    # kernel is launch/overhead bound).  If m grows, add a batch grid axis
    # (row blocks multiples of 8) with dimension_semantics=("parallel",) and
    # size the blocks against v7x's 64 MiB VMEM (raise vmem_limit_bytes via
    # pltpu.CompilerParams) rather than assuming v5e/v6e's 128 MiB headroom.
    if training:
        # Fused speaker -> argmax caption -> listener scores; the speaker
        # logits and the caption never round-trip HBM.
        scores_pad = pl.pallas_call(
            functools.partial(_fused_train_kernel, layout),
            out_shape=jax.ShapeDtypeStruct((m, SLAB_LANES), jnp.float32),
            in_specs=[_vmem_spec()],
            out_specs=_vmem_spec(),
            cost_estimate=_cost_estimate(m, n, p, k, vocab, e, h, slab_bytes,
                                         4 * m * SLAB_LANES, True),
        )(slab)
        return scores_pad[:, :n]                                         # (m, n)

    # Eval path: speaker logits only.
    # TODO(synk): eval-mode autoregressive decoding until STOP_SYMBOL is a
    # dynamic-length loop with no static-shape Pallas equivalent; we return the
    # teacher-forced logits for the provided word_seqs instead.
    logits_pad = pl.pallas_call(
        functools.partial(_speaker_eval_kernel, layout),
        out_shape=jax.ShapeDtypeStruct((m * k, SLAB_LANES), jnp.float32),
        in_specs=[_vmem_spec()],
        out_specs=_vmem_spec(),
        cost_estimate=_cost_estimate(m, n, p, k, vocab, e, h, slab_bytes,
                                     4 * m * k * SLAB_LANES, False),
    )(slab)
    logits_mkc = logits_pad[:, :vocab].reshape(m, k, vocab)
    # PyTorch convention: (m, vocab, k) so that argmax(dim=1) gives token ids.
    return jnp.transpose(logits_mkc, (0, 2, 1))


if __name__ == "__main__":
    key = jax.random.PRNGKey(0)
    pkey, ckey, wkey = jax.random.split(key, 3)

    params = init_params(pkey)
    color_seqs = jax.random.normal(ckey, (M, N_COLORS, P_COLOR), jnp.float32)
    word_seqs = jax.random.randint(wkey, (M, K_SEQ), 0, VOCAB, dtype=jnp.int32)

    # Training-mode path: fused speaker -> argmax caption -> listener scores.
    scores = encoder_decoder_listener_forward(params, color_seqs, word_seqs,
                                              training=True)
    scores = jax.block_until_ready(scores)
    assert scores.shape == (M, N_COLORS) and scores.dtype == jnp.float32
    assert bool(jnp.all(jnp.isfinite(scores)))

    # Eval-mode path: speaker logits (m, vocab, k).
    eval_logits = encoder_decoder_listener_forward(params, color_seqs, word_seqs,
                                                   training=False)
    eval_logits = jax.block_until_ready(eval_logits)
    assert eval_logits.shape == (M, VOCAB, K_SEQ)
    assert bool(jnp.all(jnp.isfinite(eval_logits)))

    print("KERNEL_OK")
</pallas_src>

<mosaic_0001>
module attributes {stable_mosaic.version = 11 : i64} {
  func.func @_fused_train_kernel(%arg0: memref<240x128xf32, #tpu.memory_space<vmem>>, %arg1: memref<2x128xf32, #tpu.memory_space<vmem>>) attributes {dimension_semantics = [], scalar_prefetch = 0 : i64, scratch_operands = 0 : i64, tpu.core_type = #tpu.core_type<tc>} {
    %c8 = arith.constant 8 : index
    %c0 = arith.constant 0 : index
    %0 = vector.load %arg0[%c8, %c0] : memref<240x128xf32, #tpu.memory_space<vmem>>, vector<16x32xf32>
    %1 = arith.truncf %0 : vector<16x32xf32> to vector<16x32xbf16>
    %c24 = arith.constant 24 : index
    %c0_0 = arith.constant 0 : index
    %2 = vector.load %arg0[%c24, %c0_0] : memref<240x128xf32, #tpu.memory_space<vmem>>, vector<32x32xf32>
    %3 = arith.truncf %2 : vector<32x32xf32> to vector<32x32xbf16>
    %c0_1 = arith.constant 0 : index
    %c0_2 = arith.constant 0 : index
    %4 = vector.load %arg0[%c0_1, %c0_2] : memref<240x128xf32, #tpu.memory_space<vmem>>, vector<6x16xf32>
    %5 = arith.truncf %4 : vector<6x16xf32> to vector<6x16xbf16>
    %c56 = arith.constant 56 : index
    %c0_3 = arith.constant 0 : index
    %6 = vector.load %arg0[%c56, %c0_3] : memref<240x128xf32, #tpu.memory_space<vmem>>, vector<16x64xf32>
    %7 = arith.truncf %6 : vector<16x64xf32> to vector<16x64xbf16>
    %c160 = arith.constant 160 : index
    %c0_4 = arith.constant 0 : index
    %8 = vector.load %arg0[%c160, %c0_4] : memref<240x128xf32, #tpu.memory_space<vmem>>, vector<16x6xf32>
    %9 = arith.truncf %8 : vector<16x6xf32> to vector<16x6xbf16>
    %c80 = arith.constant 80 : index
    %c0_5 = arith.constant 0 : index
    %10 = vector.load %arg0[%c80, %c0_5] : memref<240x128xf32, #tpu.memory_space<vmem>>, vector<32x32xf32>
    %11 = arith.truncf %10 : vector<32x32xf32> to vector<32x32xbf16>
    %c72 = arith.constant 72 : index
    %c0_6 = arith.constant 0 : index
    %12 = vector.load %arg0[%c72, %c0_6] : memref<240x128xf32, #tpu.memory_space<vmem>>, vector<3x32xf32>
    %13 = vector.extract_strided_slice %12 {offsets = [0, 0], sizes = [1, 32], strides = [1, 1]} : vector<3x32xf32> to vector<1x32xf32>
    %14 = vector.extract_strided_slice %12 {offsets = [1, 0], sizes = [1, 32], strides = [1, 1]} : vector<3x32xf32> to vector<1x32xf32>
    %cst = arith.constant dense<0.000000e+00> : vector<16x32xf32>
    %15 = tpu.matmul %1, %3, %cst {dimension_numbers = #tpu.dot_dimension_numbers<[1], [0], [0], [1], [0, 0, 1, 1], [], []>} : vector<16x32xbf16>, vector<32x32xbf16>, vector<16x32xf32> -> vector<16x32xf32>
    %cst_7 = arith.constant dense<0.000000e+00> : vector<6x64xf32>
    %16 = tpu.matmul %5, %7, %cst_7 {dimension_numbers = #tpu.dot_dimension_numbers<[1], [0], [0], [1], [0, 0, 1, 1], [], []>} : vector<6x16xbf16>, vector<16x64xbf16>, vector<6x64xf32> -> vector<6x64xf32>
    %17 = vector.extract_strided_slice %16 {offsets = [0, 0], sizes = [6, 32], strides = [1, 1]} : vector<6x64xf32> to vector<6x32xf32>
    %18 = arith.truncf %17 : vector<6x32xf32> to vector<6x32xbf16>
    %19 = vector.extract_strided_slice %16 {offsets = [0, 32], sizes = [6, 32], strides = [1, 1]} : vector<6x64xf32> to vector<6x32xf32>
    %cst_8 = arith.constant dense<0.000000e+00> : vector<16x32xf32>
    %20 = tpu.matmul %9, %18, %cst_8 {dimension_numbers = #tpu.dot_dimension_numbers<[1], [0], [0], [1], [0, 0, 1, 1], [], []>} : vector<16x6xbf16>, vector<6x32xbf16>, vector<16x32xf32> -> vector<16x32xf32>
    %21 = vector.broadcast %13 : vector<1x32xf32> to vector<16x32xf32>
    %22 = arith.addf %20, %21 : vector<16x32xf32>
    %23 = arith.addf %15, %22 : vector<16x32xf32>
    %24 = math.tanh %23 : vector<16x32xf32>
    %25 = arith.truncf %24 : vector<16x32xf32> to vector<16x32xbf16>
    %cst_9 = arith.constant dense<0.000000e+00> : vector<16x32xf32>
    %26 = tpu.matmul %25, %11, %cst_9 {dimension_numbers = #tpu.dot_dimension_numbers<[1], [0], [0], [1], [0, 0, 1, 1], [], []>} : vector<16x32xbf16>, vector<32x32xbf16>, vector<16x32xf32> -> vector<16x32xf32>
    %27 = vector.broadcast %14 : vector<1x32xf32> to vector<16x32xf32>
    %28 = arith.addf %26, %27 : vector<16x32xf32>
    %c144 = arith.constant 144 : index
    %c0_10 = arith.constant 0 : index
    %29 = vector.load %arg0[%c144, %c0_10] : memref<240x128xf32, #tpu.memory_space<vmem>>, vector<16x32xf32>
    %c176 = arith.constant 176 : index
    %c0_11 = arith.constant 0 : index
    %30 = vector.load %arg0[%c176, %c0_11] : memref<240x128xf32, #tpu.memory_space<vmem>>, vector<2x16xf32>
    %31 = arith.truncf %30 : vector<2x16xf32> to vector<2x16xbf16>
    %c112 = arith.constant 112 : index
    %c0_12 = arith.constant 0 : index
    %32 = vector.load %arg0[%c112, %c0_12] : memref<240x128xf32, #tpu.memory_space<vmem>>, vector<32x32xf32>
    %33 = arith.truncf %32 : vector<32x32xf32> to vector<32x32xbf16>
    %c184 = arith.constant 184 : index
    %c0_13 = arith.constant 0 : index
    %34 = vector.load %arg0[%c184, %c0_13] : memref<240x128xf32, #tpu.memory_space<vmem>>, vector<6x2xf32>
    %35 = arith.truncf %34 : vector<6x2xf32> to vector<6x2xbf16>
    %c192 = arith.constant 192 : index
    %c0_14 = arith.constant 0 : index
    %36 = vector.load %arg0[%c192, %c0_14] : memref<240x128xf32, #tpu.memory_space<vmem>>, vector<2x6xf32>
    %c200 = arith.constant 200 : index
    %c0_15 = arith.constant 0 : index
    %37 = vector.load %arg0[%c200, %c0_15] : memref<240x128xf32, #tpu.memory_space<vmem>>, vector<6x128xf32>
    %c72_16 = arith.constant 72 : index
    %c0_17 = arith.constant 0 : index
    %38 = vector.load %arg0[%c72_16, %c0_17] : memref<240x128xf32, #tpu.memory_space<vmem>>, vector<3x32xf32>
    %39 = vector.extract_strided_slice %38 {offsets = [2, 0], sizes = [1, 32], strides = [1, 1]} : vector<3x32xf32> to vector<1x32xf32>
    %cst_18 = arith.constant dense<0xFF800000> : vector<16xf32>
    %40 = vector.multi_reduction <maximumf>, %28, %cst_18 [1] : vector<16x32xf32> to vector<16xf32>
    %41 = vector.shape_cast %40 : vector<16xf32> to vector<16x1xf32>
    %42 = vector.broadcast %41 : vector<16x1xf32> to vector<16x32xf32>
    %43 = arith.cmpf oeq, %28, %42 : vector<16x32xf32>
    %cst_19 = arith.constant 3.100000e+01 : f32
    %44 = vector.broadcast %cst_19 : f32 to vector<16x32xf32>
    %45 = arith.select %43, %29, %44 : vector<16x32xi1>, vector<16x32xf32>
    %cst_20 = arith.constant dense<0x7F800000> : vector<16xf32>
    %46 = vector.multi_reduction <minimumf>, %45, %cst_20 [1] : vector<16x32xf32> to vector<16xf32>
    %47 = vector.shape_cast %46 : vector<16xf32> to vector<16x1xf32>
    %48 = vector.broadcast %47 : vector<16x1xf32> to vector<16x32xf32>
    %49 = arith.cmpf oeq, %48, %29 : vector<16x32xf32>
    %50 = arith.extui %49 : vector<16x32xi1> to vector<16x32xi32>
    %51 = arith.sitofp %50 : vector<16x32xi32> to vector<16x32xf32>
    %52 = arith.truncf %51 : vector<16x32xf32> to vector<16x32xbf16>
    %cst_21 = arith.constant dense<0.000000e+00> : vector<16x32xf32>
    %53 = tpu.matmul %52, %3, %cst_21 {dimension_numbers = #tpu.dot_dimension_numbers<[1], [0], [0], [1], [0, 0, 1, 1], [], []>} : vector<16x32xbf16>, vector<32x32xbf16>, vector<16x32xf32> -> vector<16x32xf32>
    %54 = arith.truncf %53 : vector<16x32xf32> to vector<16x32xbf16>
    %cst_22 = arith.constant dense<0.000000e+00> : vector<2x32xf32>
    %55 = tpu.matmul %31, %54, %cst_22 {dimension_numbers = #tpu.dot_dimension_numbers<[1], [0], [0], [1], [0, 0, 1, 1], [], []>} : vector<2x16xbf16>, vector<16x32xbf16>, vector<2x32xf32> -> vector<2x32xf32>
    %56 = arith.truncf %55 : vector<2x32xf32> to vector<2x32xbf16>
    %cst_23 = arith.constant dense<0.000000e+00> : vector<2x32xf32>
    %57 = tpu.matmul %56, %33, %cst_23 {dimension_numbers = #tpu.dot_dimension_numbers<[1], [0], [0], [1], [0, 0, 1, 1], [], []>} : vector<2x32xbf16>, vector<32x32xbf16>, vector<2x32xf32> -> vector<2x32xf32>
    %58 = vector.broadcast %39 : vector<1x32xf32> to vector<2x32xf32>
    %59 = arith.addf %57, %58 : vector<2x32xf32>
    %60 = math.tanh %59 : vector<2x32xf32>
    %61 = arith.truncf %60 : vector<2x32xf32> to vector<2x32xbf16>
    %cst_24 = arith.constant dense<0.000000e+00> : vector<6x32xf32>
    %62 = tpu.matmul %35, %61, %cst_24 {dimension_numbers = #tpu.dot_dimension_numbers<[1], [0], [0], [1], [0, 0, 1, 1], [], []>} : vector<6x2xbf16>, vector<2x32xbf16>, vector<6x32xf32> -> vector<6x32xf32>
    %63 = arith.mulf %62, %19 : vector<6x32xf32>
    %cst_25 = arith.constant dense<0.000000e+00> : vector<6xf32>
    %64 = vector.multi_reduction <add>, %63, %cst_25 [1] : vector<6x32xf32> to vector<6xf32>
    %65 = vector.shape_cast %64 : vector<6xf32> to vector<6x1xf32>
    %66 = vector.broadcast %65 : vector<6x1xf32> to vector<6x128xf32>
    %67 = arith.mulf %66, %37 : vector<6x128xf32>
    %cst_26 = arith.constant dense<0.000000e+00> : vector<2x128xf32>
    %68 = tpu.matmul %36, %67, %cst_26 {dimension_numbers = #tpu.dot_dimension_numbers<[1], [0], [0], [1], [0, 0, 1, 1], [], []>} : vector<2x6xf32>, vector<6x128xf32>, vector<2x128xf32> -> vector<2x128xf32>
    %c0_27 = arith.constant 0 : index
    %c0_28 = arith.constant 0 : index
    %69 = vector.load %arg1[%c0_27, %c0_28] : memref<2x128xf32, #tpu.memory_space<vmem>>, vector<2x128xf32>
    tpu.vector_store %arg1[%c0_27, %c0_28], %68 {strides = array<i32>} : memref<2x128xf32, #tpu.memory_space<vmem>>, vector<2x128xf32>,
    return
  }
}

</mosaic_0001>

<bundles_post_ra>
// kernel: eq.1
= control target key start
LH: loop header
LB: loop body
LE: loop exit
PB: predicated region body
PF: predicated region fallthrough
CT: control target
= control target key end

     0   :  { %vm7_vm0 = vcmask 64512   ;;  %vm13_vm1 = vcmask 130112   ;;  %s39_s0 = inlined_call_operand.vmem [shape: s32[2,8], index: 0, kind: input, shape index: {}]   ;;  %s40_s1 = inlined_call_operand.vmem [shape: s32[16], index: 1, kind: output, shape index: {}]  }
   0x1   :  { %v4_v0 = vld [vmem:[%s39_s0] sm:$0x3]  ;;  %s22_s0 = smov 8  }
   0x2   :  { %5 = vst [vmem:[#allocation1] sm:$0x3] %v4_v0 }
   0x9   :  { %v10_v1 = vld [vmem:[#allocation1 + $0x1] sm:$0x1]   ;;  %v6_v2 = vld [vmem:[#allocation1] sm:$0x1]  }
   0xa   :  { %11 = vrot.lane.b32.xlu0 %v10_v1, %s22_s0  ;;  %8 = vst.msk [vmem:[#allocation0] sm:$0x1] %vm7_vm0, %v6_v2  }
  0x7c   :  { %v12_v3 = vpop.permute.xlu0 %11  }
  0x7d   :  { %14 = vst.msk [vmem:[#allocation0] sm:$0x1] %vm13_vm1, %v12_v3  }
  0x84   :  { %v18_v4 = vld [vmem:[#allocation0] sm:$0x1] }
  0x85   :  { %20 = vst [vmem:[%s40_s1] sm:$0x1] %v18_v4 }

// kernel: encoder_decoder_listener_forward.1
= control target key start
LH: loop header
LB: loop body
LE: loop exit
PB: predicated region body
PF: predicated region fallthrough
CT: control target
= control target key end

     0   :  { %v688_v3 = vmov 0.0   ;;  %vm689_vm0 = vmmov 0   ;;  %s852_s0 = inlined_call_operand.vmem [shape: f32[240,128], index: 0, kind: input, shape index: {}]   ;;  %s853_s1 = inlined_call_operand.hbm [shape: f32[2,128], index: 1, kind: output, shape index: {}]  }
   0x1   :  { %v21_v0 = vld [vmem:[%s852_s0 + $0x38] sm:$0xff]  ;;  %v22_v1 = vld [vmem:[%s852_s0 + $0x40] sm:$0xff]  ;;  %587 = vmatprep.subr.bf16.mxu0 %v688_v3  ;;  %589 = vmatprep.mubr.msk.bf16.mxu0 %vm689_vm0, %v688_v3 }
   0x2   :  { %v19_v2 = vld [vmem:[%s852_s0] sm:$0x3f]  ;;  %v23_v4 = vpack.c.bf16 %v22_v1, %v21_v0 }
   0x3   :  { %6 = vsyncpa [#allocation3], 0  ;;  %v20_v5 = vpack.c.bf16 %v19_v2, %v19_v2  ;;  %593 = vmatprep.subr.bf16.mxu1 %v688_v3  ;;  %595 = vmatprep.mubr.msk.bf16.mxu1 %vm689_vm0, %v688_v3  ;;  %vm34_vm1 = vcmask 130048   ;;  %vm87_vm2 = vcmask 1042432   ;;  %v24_v7 = vld [vmem:[%s852_s0 + $0xa0] sm:$0xff]  ;;  %v25_v8 = vld [vmem:[%s852_s0 + $0xa8] sm:$0xff]  ;;  %v79_v30 = vlaneseq }
   0x4   :  { %588 = vmatpush3.bf16.msra.mxu0 %v23_v4  ;;  %v13_v11 = vld [vmem:[%s852_s0 + $0x18] sm:$0xff]  ;;  %v14_v12 = vld [vmem:[%s852_s0 + $0x20] sm:$0xff]  ;;  %v26_v16 = vpack.c.bf16 %v25_v8, %v24_v7  ;;  %vm83_vm3 = vcmask 48128   ;;  %v15_v18 = vld [vmem:[%s852_s0 + $0x28] sm:$0xff]  ;;  %vm132_vm4 = vcmask 261120   ;;  %s690_s9 = smov 96  }
   0x5   :  { %607 = vmatprep.subr.bf16.mxu0 %v688_v3  ;;  %v17_v17 = vpack.c.bf16 %v14_v12, %v13_v11  ;;  %v16_v19 = vld [vmem:[%s852_s0 + $0x30] sm:$0xff]  ;;  %v10_v21 = vld [vmem:[%s852_s0 + $0x8] sm:$0xff]  ;;  %v28_v25 = vld [vmem:[%s852_s0 + $0x58] sm:$0xff]  ;;  %v772_v31 = vshrl.u32 %v79_v30, 7  ;;  %vm407_vm9 = vcmask 1040384   ;;  %vm403_vm10 = vcmask 15360  }
   0x6   :  { %v18_v20 = vpack.c.bf16 %v16_v19, %v15_v18  ;;  %v11_v22 = vld [vmem:[%s852_s0 + $0x10] sm:$0xff]  ;;  %v29_v26 = vld [vmem:[%s852_s0 + $0x60] sm:$0xff]  ;;  %v30_v28 = vld [vmem:[%s852_s0 + $0x68] sm:$0xff]  ;;  %vm456_vm11 = vcmask 259072   ;;  %vm464_vm12 = vcmask 1045504   ;;  %s691_s30 = smov [#allocation2]  }
   0x7   :  { %590 = vmatmul.mubr.msk.bf16.vlgmr.msra.gmra.mrb[0].mxu0 %vm34_vm1, %v20_v5  ;;  %v12_v23 = vpack.c.bf16 %v11_v22, %v10_v21  ;;  %v27_v24 = vld [vmem:[%s852_s0 + $0x50] sm:$0xff]  ;;  %v32_v29 = vpack.c.bf16 %v30_v28, %v29_v26  ;;  %v81_v32 = vsub.s32 0, %v772_v31  ;;  %v778_v33 = vld [vmem:[%s852_s0 + $0x48] sm:$0x7]  ;;  %v182_v44 = vsub.s32 1, %v772_v31  ;;  %v229_v58 = vld [vmem:[%s852_s0 + $0x98] sm:$0xff] }
   0x8   :  { %611 = vmatprep.mubr.msk.bf16.mxu0 %vm689_vm0, %v688_v3  ;;  %v31_v27 = vpack.c.bf16 %v28_v25, %v27_v24  ;;  %v228_v54 = vld [vmem:[%s852_s0 + $0x90] sm:$0xff]  ;;  %v233_v5 = vld [vmem:[%s852_s0 + $0x78] sm:$0xff]  ;;  %v356_v22 = vsub.s32 2, %v772_v31  ;;  %s545_s2 = sshll.u32 %s691_s30, 4  ;;  %s546_s2 = int_to_ptr.vmem [resolvable:$true] %s545_s2 }
   0x9   :  { %v82_v34 = vrot.slane %v778_v33, %v81_v32  ;;  %v183_v45 = vrot.slane %v778_v33, %v182_v44  ;;  %v232_v4 = vld [vmem:[%s852_s0 + $0x70] sm:$0xff]  ;;  %v238_v30 = vld [vmem:[%s852_s0 + $0xb8] sm:$0x3f]  ;;  %s664_s3 = scalar_lea.vmem %s546_s2, 32  ;;  %p669_p1 = scmp.lt.s32.totalorder %s546_s2, %s546_s2 }
   0xa   :  { %608 = vmatpush3.bf16.msra.mxu0 %v31_v27  ;;  %p665_p0 = scmp.ne.s32.totalorder %s546_s2, %s664_s3  ;;  %p670_p2 = scmp.lt.s32.totalorder %s664_s3, %s664_s3 }
   0xb   :  { %609 = vmatprep.subr.bf16.mxu0 %v688_v3 }
   0xc   :  { %p671_p3 = por %p670_p2, %p669_p1 }
   0xe   :  { %610 = vmatpush3.bf16.msra.mxu0 %v32_v29  ;;  %p672_p4 = pnand %p671_p3, %p665_p0 }
   0xf   :  { %615 = vmatprep.subr.bf16.mxu0 %v688_v3 }
  0xda   :  { %v721_v6 = vpop.f32.mrb[0].mxu0 }
  0xdb   :  { %v78_v9 = vpack.c.bf16 %v721_v6, %v721_v6  ;;  %v591_v10 = vpop.f32.mrb[1].mxu0 }
  0xdc   :  { %v75_v13 = vpop.f32.mrb[2].mxu0 }
  0xdd   :  { %v592_v14 = vpop.f32.mrb[3].mxu0  ;;  %v89_v15 = vsel %vm87_vm2, %v78_v9, 0  ;;  %v230_v9 = vld [vmem:[%s852_s0 + $0xb0] sm:$0x3] }
  0xde   :  { %594 = vmatpush3.bf16.msra.mxu1 %v89_v15  ;;  %v231_v13 = vpack.c.bf16 %v230_v9, %v230_v9  ;;  %v234_v14 = vld [vmem:[%s852_s0 + $0x80] sm:$0xff]  ;;  %v235_v15 = vld [vmem:[%s852_s0 + $0x88] sm:$0xff] }
  0xdf   :  { %599 = vmatprep.subr.bf16.mxu1 %v688_v3 }
  0xe1   :  { %596 = vmatmul.mubr.msk.bf16.vlgmr.msra.gmra.mrb[0].mxu1 %vm83_vm3, %v26_v16  ;;  %v237_v16 = vpack.c.bf16 %v235_v15, %v234_v14 }
  0xe2   :  { %600 = vmatpush3.bf16.msra.mxu1 %v17_v17  ;;  %603 = vmatprep.mubr.msk.bf16.mxu1 %vm689_vm0, %v688_v3 }
  0xe3   :  { %601 = vmatprep.subr.bf16.mxu1 %v688_v3 }
  0xe6   :  { %602 = vmatpush3.bf16.msra.mxu1 %v18_v20 }
  0xe7   :  { %623 = vmatprep.subr.bf16.mxu1 %v688_v3 }
  0xed   :  { %604 = vmatmul.mubr.msk.bf16.vlgmr.msra.gmra.mrb[0].mxu1 %vm132_vm4, %v12_v23  ;;  %v357_v23 = vrot.slane %v778_v33, %v356_v22 }
  0xee   :  { %625 = vmatprep.mubr.msk.bf16.mxu1 %vm689_vm0, %v688_v3 }
 0x1c0   :  { %v170_v35 = vpop.f32.mrb[0].mxu1 }
 0x1c1   :  { %v648_v36 = vadd.f32 %v170_v35, %v82_v34  ;;  %v605_v37 = vpop.f32.mrb[1].mxu1  ;;  %v239_v35 = vpack.c.bf16 %v238_v30, %v238_v30 }
 0x1c2   :  { %v173_v38 = vpop.f32.mrb[2].mxu1 }
 0x1c3   :  { %v649_v39 = vadd.f32 %v173_v38, %v82_v34  ;;  %v606_v40 = vpop.f32.mrb[3].mxu1  ;;  %658 = vtanh.f32 %v648_v36 }
 0x1c4   :  { %v241_v40 = vld [vmem:[%s852_s0 + $0xc8] sm:$0x3f] }
 0x1c5   :  { %660 = vtanh.f32 %v649_v39 }
 0x1cd   :  { %v659_v41 = vpop.eup %658 }
 0x1cf   :  { %v661_v42 = vpop.eup %660 }
 0x1d0   :  { %v179_v43 = vpack.c.bf16 %v661_v42, %v659_v41 }
 0x1d2   :  { %612 = vmatmul.mubr.msk.bf16.vlgmr.msra.gmra.mrb[4].mxu0 %vm132_vm4, %v179_v43  ;;  %v240_v43 = vld [vmem:[%s852_s0 + $0xc0] sm:$0x3] }
 0x1d3   :  { %616 = vmatpush3.bf16.msra.mxu0 %v17_v17  ;;  %619 = vmatprep.mubr.msk.bf16.mxu0 %vm689_vm0, %v688_v3 }
 0x1d4   :  { %617 = vmatprep.subr.bf16.mxu0 %v688_v3 }
 0x1d7   :  { %618 = vmatpush3.bf16.msra.mxu0 %v18_v20 }
 0x1d8   :  { %629 = vmatprep.subr.bf16.mxu0 %v688_v3 }
 0x2a5   :  { %v221_v46 = vpop.f32.mrb[4].mxu0 }
 0x2a6   :  { %v222_v47 = vadd.f32 %v221_v46, %v183_v45  ;;  %v613_v48 = vpop.f32.mrb[5].mxu0 }
 0x2a7   :  { %v224_v49 = vpop.f32.mrb[6].mxu0 }
 0x2a8   :  { %v225_v50 = vadd.f32 %v224_v49, %v183_v45  ;;  %v614_v51 = vpop.f32.mrb[7].mxu0  ;;  %v242_v52 = vsel %vm132_vm4, %v222_v47, -inf }
 0x2a9   :  { %243 = vmax.xlane.f32.xlu0 %v242_v52 }
 0x2aa   :  { %v245_v53 = vsel %vm132_vm4, %v225_v50, -inf }
 0x2ad   :  { %246 = vmax.xlane.f32.xlu0 %v245_v53 }
 0x2c3   :  { %452 = vrot.lane.b32.xlu0 %v721_v6, %s690_s9  ;;  %v236_v6 = vpack.c.bf16 %v233_v5, %v232_v4 }
 0x336   :  { %v244_v55 = vpop.xlane.xlu0 %243 }
 0x337   :  { %vm248_vm5 = vcmp.eq.f32.partialorder %v222_v47, %v244_v55 }
 0x338   :  { %v250_v56 = vsel %vm248_vm5, %v228_v54, 31.0 }
 0x339   :  { %v252_v57 = vsel %vm132_vm4, %v250_v56, inf }
 0x33a   :  { %253 = vmin.xlane.f32.xlu1 %v252_v57  ;;  %v247_v59 = vpop.xlane.xlu0 %246 }
 0x33b   :  { %vm249_vm6 = vcmp.eq.f32.partialorder %v225_v50, %v247_v59 }
 0x33c   :  { %v251_v60 = vsel %vm249_vm6, %v229_v58, 31.0 }
 0x33d   :  { %v255_v61 = vsel %vm132_vm4, %v251_v60, inf }
 0x33e   :  { %256 = vmin.xlane.f32.xlu1 %v255_v61 }
 0x3c7   :  { %v254_v62 = vpop.xlane.xlu1 %253 }
 0x3c8   :  { %vm258_vm7 = vcmp.eq.f32.partialorder %v254_v62, %v228_v54 }
 0x3c9   :  { %v557_v0 = vsel %vm258_vm7, 1.0, %v688_v3 }
 0x3cb   :  { %v257_v63 = vpop.xlane.xlu1 %256 }
 0x3cc   :  { %vm259_vm8 = vcmp.eq.f32.partialorder %v257_v63, %v229_v58 }
 0x3cd   :  { %v558_v1 = vsel %vm259_vm8, 1.0, %v688_v3 }
 0x3ce   :  { %v264_v2 = vpack.c.bf16 %v558_v1, %v557_v0 }
 0x3d0   :  { %620 = vmatmul.mubr.msk.bf16.vlgmr.msra.gmra.mrb[8].mxu0 %vm132_vm4, %v264_v2 }
 0x3d1   :  { %633 = vmatprep.mubr.msk.bf16.mxu0 %vm689_vm0, %v688_v3  ;;  %630 = vmatpush3.bf16.msra.mxu0 %v236_v6 }
 0x3d2   :  { %631 = vmatprep.subr.bf16.mxu0 %v688_v3 }
 0x3d5   :  { %632 = vmatpush3.bf16.msra.mxu0 %v237_v16 }
 0x3d6   :  { %643 = vmatprep.subr.mxu0 %v688_v3 }
 0x4a3   :  { %v302_v7 = vpop.f32.mrb[8].mxu0 }
 0x4a4   :  { %v621_v8 = vpop.f32.mrb[9].mxu0 }
 0x4a5   :  { %v305_v10 = vpop.f32.mrb[10].mxu0 }
 0x4a6   :  { %v309_v11 = vpack.c.bf16 %v305_v10, %v302_v7  ;;  %v622_v12 = vpop.f32.mrb[11].mxu0 }
 0x4a8   :  { %624 = vmatpush3.bf16.msra.mxu1 %v309_v11 }
 0x4a9   :  { %637 = vmatprep.subr.bf16.mxu1 %v688_v3 }
 0x4ab   :  { %626 = vmatmul.mubr.msk.bf16.vlgmr.msra.gmra.mrb[4].mxu1 %vm34_vm1, %v231_v13 }
 0x4ac   :  { %639 = vmatprep.mubr.msk.bf16.mxu1 %vm689_vm0, %v688_v3 }
 0x57e   :  { %v347_v17 = vpop.f32.mrb[4].mxu1 }
 0x57f   :  { %v353_v18 = vpack.c.bf16 %v347_v17, %v347_v17  ;;  %v627_v19 = vpop.f32.mrb[5].mxu1 }
 0x580   :  { %v350_v20 = vpop.f32.mrb[6].mxu1 }
 0x581   :  { %v628_v21 = vpop.f32.mrb[7].mxu1  ;;  %634 = vmatmul.mubr.msk.bf16.vlgmr.msra.gmra.mrb[12].mxu0 %vm132_vm4, %v353_v18 }
 0x582   :  { %645 = vmatprep.mubr.msk.f32.mxu0 %vm689_vm0, %v688_v3  ;;  %v453_v3 = vpop.permute.xlu0 %452 }
 0x654   :  { %v395_v24 = vpop.f32.mrb[12].mxu0 }
 0x655   :  { %v396_v25 = vadd.f32 %v395_v24, %v357_v23  ;;  %v635_v26 = vpop.f32.mrb[13].mxu0 }
 0x656   :  { %v398_v27 = vpop.f32.mrb[14].mxu0 }
 0x657   :  { %662 = vtanh.f32 %v396_v25  ;;  %v636_v28 = vpop.f32.mrb[15].mxu0 }
 0x661   :  { %v663_v29 = vpop.eup %662 }
 0x662   :  { %v402_v32 = vpack.c.bf16 %v663_v29, %v663_v29 }
 0x664   :  { %v409_v34 = vsel %vm407_vm9, %v402_v32, 0 }
 0x665   :  { %638 = vmatpush3.bf16.msra.mxu1 %v409_v34 }
 0x668   :  { %640 = vmatmul.mubr.msk.bf16.vlgmr.msra.gmra.mrb[8].mxu1 %vm403_vm10, %v239_v35 }
 0x73b   :  { %v445_v31 = vpop.f32.mrb[8].mxu1 }
 0x73c   :  { %v455_v33 = vmul.f32 %v453_v3, %v445_v31  ;;  %v641_v36 = vpop.f32.mrb[9].mxu1 }
 0x73d   :  { %v448_v37 = vpop.f32.mrb[10].mxu1 }
 0x73e   :  { %v642_v38 = vpop.f32.mrb[11].mxu1  ;;  %v457_v39 = vsel %vm456_vm11, %v455_v33, 0.0 }
 0x73f   :  { %458 = vadd.xlane.f32.xlu1 %v457_v39 }
 0x7cc   :  { %v459_v41 = vpop.xlane.xlu1 %458 }
 0x7cd   :  { %v460_v42 = vmul.f32 %v459_v41, %v241_v40 }
 0x7cf   :  { %644 = vmatpush3.msk.msra.mxu0 %vm464_vm12, %v460_v42 }
 0x7d0   :  { %646 = vmatmul.mubr.msk.f32.vlgmr.msra.gmra.mrb[16].mxu0 %vm83_vm3, %v240_v43 }
 0x8a3   :  { %v534_v44 = vpop.f32.mrb[16].mxu0 }
 0x8a4   :  { %538 = vst [vmem:[#allocation2] sm:$0x3] %v534_v44  ;;  %v647_v45 = vpop.f32.mrb[17].mxu0 }
 0x8a5   :  { %675 = shalt.err (!%p672_p4)
}
 0x8a6   :  { %s676_s0 = scalar_lea.hbm %s853_s1, 32 }
 0x8a7   :  { %p677_p5 = scmp.ne.s32.totalorder %s853_s1, %s676_s0  ;;  %p680_p6 = scmp.lt.u32.totalorder %s676_s0, %s853_s1 }
 0x8a9   :  { %p682_p7 = pnand %p680_p6, %p677_p5 }
 0x8ab   :  { %685 = shalt.err (!%p682_p7)
}
 0x8ac   :  { %548 = dma.vmem_to_hbm [thread:$0]  %s546_s2, 32, %s853_s1, [#allocation3]  }
 0x8ad   :  { %686 = dma.done.wait [#allocation3], 32  }
 0x8ae   :  { %687 = vsyncadd [#allocation3], 4294967264 }
 0x8af   :  { %552 = vsyncpa [#allocation3], 1 }

</bundles_post_ra>
